<compile_context>
chip_gen: v7x
topology: tpu7x:2x2x1
jax: 0.10.0
libtpu: 0.0.40
codegen_flags: <defaults>
</compile_context>

<pallas_src>
import jax
import jax.numpy as jnp
from jax.experimental import pallas as pl
from jax.experimental.pallas import tpu as pltpu

LANE = 128      # vreg lane width / MXU-friendly minor dim
SUBLANE = 8     # f32 sublane count


def _round_up(n, m):
    return ((n + m - 1) // m) * m


def _pad2d(a, rows, cols):
    r, c = a.shape
    return jnp.pad(a, ((0, rows - r), (0, cols - c)))


# ----------------------------- kernels --------------------------------------


def _mlp_kernel_train(x_ref, w1_ref, b1_ref, m1_ref, w2_ref, b2_ref, m2_ref,
                      w3_ref, b3_ref, out_ref):
    # Layer 1: Linear (bf16 x bf16 -> f32 acc) + bias (f32) + fused ReLU+dropout.
    h = jnp.dot(x_ref[...], w1_ref[...],
                preferred_element_type=jnp.float32) + b1_ref[...]
    h = jnp.maximum(h, 0.0) * m1_ref[...]          # mask holds 0 or 1/(1-p)

    # Layer 2.
    h = jnp.dot(h.astype(w2_ref.dtype), w2_ref[...],
                preferred_element_type=jnp.float32) + b2_ref[...]
    h = jnp.maximum(h, 0.0) * m2_ref[...]

    # Layer 3: logits.
    out = jnp.dot(h.astype(w3_ref.dtype), w3_ref[...],
                  preferred_element_type=jnp.float32) + b3_ref[...]
    out_ref[...] = out.astype(out_ref.dtype)


def _mlp_kernel_eval(x_ref, w1_ref, b1_ref, w2_ref, b2_ref, w3_ref, b3_ref,
                     out_ref):
    h = jnp.dot(x_ref[...], w1_ref[...],
                preferred_element_type=jnp.float32) + b1_ref[...]
    h = jnp.maximum(h, 0.0)
    h = jnp.dot(h.astype(w2_ref.dtype), w2_ref[...],
                preferred_element_type=jnp.float32) + b2_ref[...]
    h = jnp.maximum(h, 0.0)
    out = jnp.dot(h.astype(w3_ref.dtype), w3_ref[...],
                  preferred_element_type=jnp.float32) + b3_ref[...]
    out_ref[...] = out.astype(out_ref.dtype)


# ----------------------------- wrapper ---------------------------------------


def neural_net_forward(x, params, seed, *, training=True, tile_m=512,
                       compute_dtype=jnp.bfloat16):
    """Forward pass matching NeuralNet.forward (F.dropout defaults to
    training=True in the reference module). x: any shape flattening to
    (-1, input_size)."""
    w1, b1 = params["w1"], params["b1"]   # (in, hid), (1, hid)
    w2, b2 = params["w2"], params["b2"]   # (hid, hid), (1, hid)
    w3, b3 = params["w3"], params["b3"]   # (hid, cls), (1, cls)
    input_size = w1.shape[0]
    hidden_size = w1.shape[1]
    num_classes = w3.shape[1]

    # Lane-dense padded feature dims (multiples of 128).
    in_pad = _round_up(input_size, LANE)
    hid_pad = _round_up(hidden_size, LANE)
    cls_pad = _round_up(num_classes, LANE)

    # Flatten + batch tiling: TM multiple of the f32 sublane count.
    xf = x.reshape(-1, input_size)
    batch = xf.shape[0]
    tm = _round_up(min(tile_m, _round_up(batch, SUBLANE)), SUBLANE)
    batch_pad = _round_up(batch, tm)
    grid_m = batch_pad // tm

    # Cast matmul operands to bf16 in the wrapper (halves HBM traffic),
    # zero-pad to lane-dense shapes. Biases stay f32 (added post-accumulation).
    xp = _pad2d(xf.astype(compute_dtype), batch_pad, in_pad)
    w1p = _pad2d(w1.astype(compute_dtype), in_pad, hid_pad)
    w2p = _pad2d(w2.astype(compute_dtype), hid_pad, hid_pad)
    w3p = _pad2d(w3.astype(compute_dtype), hid_pad, cls_pad)
    b1p = _pad2d(b1.astype(jnp.float32), 1, hid_pad)
    b2p = _pad2d(b2.astype(jnp.float32), 1, hid_pad)
    b3p = _pad2d(b3.astype(jnp.float32), 1, cls_pad)

    x_spec = pl.BlockSpec((tm, in_pad), lambda i: (i, 0))
    out_spec = pl.BlockSpec((tm, cls_pad), lambda i: (i, 0))
    mask_spec = pl.BlockSpec((tm, hid_pad), lambda i: (i, 0))

    def resident(shape):
        # Weights/biases: same block every grid step -> stays VMEM-resident.
        return pl.BlockSpec(shape, lambda i: (0, 0))

    if training:
        # Inverted-dropout masks (values 0 or 1/(1-p)), deterministic in `seed`.
        # Per-row masks, so tiling never reuses an identical mask.
        p1, p2 = 0.5, 0.1
        k1, k2 = jax.random.split(jax.random.PRNGKey(seed))
        m1 = (jax.random.bernoulli(k1, 1.0 - p1, (batch_pad, hid_pad))
              .astype(jnp.float32) * (1.0 / (1.0 - p1)))
        m2 = (jax.random.bernoulli(k2, 1.0 - p2, (batch_pad, hid_pad))
              .astype(jnp.float32) * (1.0 / (1.0 - p2)))
        kernel = _mlp_kernel_train
        args = (xp, w1p, b1p, m1, w2p, b2p, m2, w3p, b3p)
        in_specs = [
            x_spec,
            resident((in_pad, hid_pad)), resident((1, hid_pad)), mask_spec,
            resident((hid_pad, hid_pad)), resident((1, hid_pad)), mask_spec,
            resident((hid_pad, cls_pad)), resident((1, cls_pad)),
        ]
    else:
        kernel = _mlp_kernel_eval
        args = (xp, w1p, b1p, w2p, b2p, w3p, b3p)
        in_specs = [
            x_spec,
            resident((in_pad, hid_pad)), resident((1, hid_pad)),
            resident((hid_pad, hid_pad)), resident((1, hid_pad)),
            resident((hid_pad, cls_pad)), resident((1, cls_pad)),
        ]

    out_padded = pl.pallas_call(
        kernel,
        out_shape=jax.ShapeDtypeStruct((batch_pad, cls_pad), jnp.float32),
        grid=(grid_m,),
        in_specs=in_specs,
        out_specs=out_spec,
        compiler_params=pltpu.CompilerParams(
            dimension_semantics=("parallel",),     # megacore-shard batch tiles
            vmem_limit_bytes=32 * 1024 * 1024,     # headroom; safe on v5e/v6e/v7x
        ),
    )(*args)

    # Strip batch padding and the padded logit columns.
    return out_padded[:batch, :num_classes]


def init_params(key, input_size, hidden_size, num_classes):
    """Deterministic init mimicking nn.Linear (uniform(-1/sqrt(fan_in), +))."""
    def linear(k, fan_in, fan_out):
        kw, kb = jax.random.split(k)
        bound = 1.0 / jnp.sqrt(float(fan_in))
        w = jax.random.uniform(kw, (fan_in, fan_out), jnp.float32, -bound, bound)
        b = jax.random.uniform(kb, (1, fan_out), jnp.float32, -bound, bound)
        return w, b

    k1, k2, k3 = jax.random.split(key, 3)
    w1, b1 = linear(k1, input_size, hidden_size)
    w2, b2 = linear(k2, hidden_size, hidden_size)
    w3, b3 = linear(k3, hidden_size, num_classes)
    return {"w1": w1, "b1": b1, "w2": w2, "b2": b2, "w3": w3, "b3": b3}


if __name__ == "__main__":
    key = jax.random.PRNGKey(0)
    kx, kp = jax.random.split(key)

    # Small shapes consistent with the module: NCHW input flattened to input_size.
    batch, channels, spatial = 2, 4, 16
    input_size = channels * spatial * spatial     # 1024
    hidden_size = 32
    num_classes = 10

    x = jax.random.normal(kx, (batch, channels, spatial, spatial), jnp.float32)
    params = init_params(kp, input_size, hidden_size, num_classes)

    out = neural_net_forward(x, params, seed=0, training=True)
    out = jax.block_until_ready(out)

    assert out.shape == (batch, num_classes)
    assert out.dtype == jnp.float32
    assert bool(jnp.all(jnp.isfinite(out)))
    print("KERNEL_OK")
</pallas_src>

<mosaic_0001>
module attributes {stable_mosaic.version = 11 : i64} {
  func.func @_mlp_kernel_train(%arg0: i32, %arg1: memref<8x1024xbf16, #tpu.memory_space<vmem>>, %arg2: memref<1024x128xbf16, #tpu.memory_space<vmem>>, %arg3: memref<1x128xf32, #tpu.memory_space<vmem>>, %arg4: memref<8x128xf32, #tpu.memory_space<vmem>>, %arg5: memref<128x128xbf16, #tpu.memory_space<vmem>>, %arg6: memref<1x128xf32, #tpu.memory_space<vmem>>, %arg7: memref<8x128xf32, #tpu.memory_space<vmem>>, %arg8: memref<128x128xbf16, #tpu.memory_space<vmem>>, %arg9: memref<1x128xf32, #tpu.memory_space<vmem>>, %arg10: memref<8x128xf32, #tpu.memory_space<vmem>>) attributes {dimension_semantics = [#tpu.dimension_semantics<parallel>], iteration_bounds = array<i64: 1>, scalar_prefetch = 0 : i64, scratch_operands = 0 : i64, tpu.core_type = #tpu.core_type<tc>, window_params = [{transform_indices = @transform_0, window_bounds = array<i64: 8, 1024>}, {pipeline_mode = #tpu.pipeline_mode<synchronous>, transform_indices = @transform_1, window_bounds = array<i64: 1024, 128>}, {pipeline_mode = #tpu.pipeline_mode<synchronous>, transform_indices = @transform_2, window_bounds = array<i64: 1, 128>}, {transform_indices = @transform_3, window_bounds = array<i64: 8, 128>}, {pipeline_mode = #tpu.pipeline_mode<synchronous>, transform_indices = @transform_4, window_bounds = array<i64: 128, 128>}, {pipeline_mode = #tpu.pipeline_mode<synchronous>, transform_indices = @transform_5, window_bounds = array<i64: 1, 128>}, {transform_indices = @transform_6, window_bounds = array<i64: 8, 128>}, {pipeline_mode = #tpu.pipeline_mode<synchronous>, transform_indices = @transform_7, window_bounds = array<i64: 128, 128>}, {pipeline_mode = #tpu.pipeline_mode<synchronous>, transform_indices = @transform_8, window_bounds = array<i64: 1, 128>}, {transform_indices = @transform_9, window_bounds = array<i64: 8, 128>}]} {
    %c0 = arith.constant 0 : index
    %c0_0 = arith.constant 0 : index
    %0 = vector.load %arg1[%c0, %c0_0] : memref<8x1024xbf16, #tpu.memory_space<vmem>>, vector<8x1024xbf16>
    %c0_1 = arith.constant 0 : index
    %c0_2 = arith.constant 0 : index
    %1 = vector.load %arg2[%c0_1, %c0_2] : memref<1024x128xbf16, #tpu.memory_space<vmem>>, vector<1024x128xbf16>
    %cst = arith.constant dense<0.000000e+00> : vector<8x128xf32>
    %2 = tpu.matmul %0, %1, %cst {dimension_numbers = #tpu.dot_dimension_numbers<[1], [0], [0], [1], [0, 0, 1, 1], [], []>} : vector<8x1024xbf16>, vector<1024x128xbf16>, vector<8x128xf32> -> vector<8x128xf32>
    %c0_3 = arith.constant 0 : index
    %c0_4 = arith.constant 0 : index
    %3 = vector.load %arg3[%c0_3, %c0_4] : memref<1x128xf32, #tpu.memory_space<vmem>>, vector<1x128xf32>
    %4 = vector.broadcast %3 : vector<1x128xf32> to vector<8x128xf32>
    %5 = arith.addf %2, %4 : vector<8x128xf32>
    %cst_5 = arith.constant 0.000000e+00 : f32
    %6 = vector.broadcast %cst_5 : f32 to vector<8x128xf32>
    %7 = arith.maximumf %5, %6 : vector<8x128xf32>
    %c0_6 = arith.constant 0 : index
    %c0_7 = arith.constant 0 : index
    %8 = vector.load %arg4[%c0_6, %c0_7] : memref<8x128xf32, #tpu.memory_space<vmem>>, vector<8x128xf32>
    %9 = arith.mulf %7, %8 : vector<8x128xf32>
    %10 = arith.truncf %9 : vector<8x128xf32> to vector<8x128xbf16>
    %c0_8 = arith.constant 0 : index
    %c0_9 = arith.constant 0 : index
    %11 = vector.load %arg5[%c0_8, %c0_9] : memref<128x128xbf16, #tpu.memory_space<vmem>>, vector<128x128xbf16>
    %cst_10 = arith.constant dense<0.000000e+00> : vector<8x128xf32>
    %12 = tpu.matmul %10, %11, %cst_10 {dimension_numbers = #tpu.dot_dimension_numbers<[1], [0], [0], [1], [0, 0, 1, 1], [], []>} : vector<8x128xbf16>, vector<128x128xbf16>, vector<8x128xf32> -> vector<8x128xf32>
    %c0_11 = arith.constant 0 : index
    %c0_12 = arith.constant 0 : index
    %13 = vector.load %arg6[%c0_11, %c0_12] : memref<1x128xf32, #tpu.memory_space<vmem>>, vector<1x128xf32>
    %14 = vector.broadcast %13 : vector<1x128xf32> to vector<8x128xf32>
    %15 = arith.addf %12, %14 : vector<8x128xf32>
    %cst_13 = arith.constant 0.000000e+00 : f32
    %16 = vector.broadcast %cst_13 : f32 to vector<8x128xf32>
    %17 = arith.maximumf %15, %16 : vector<8x128xf32>
    %c0_14 = arith.constant 0 : index
    %c0_15 = arith.constant 0 : index
    %18 = vector.load %arg7[%c0_14, %c0_15] : memref<8x128xf32, #tpu.memory_space<vmem>>, vector<8x128xf32>
    %19 = arith.mulf %17, %18 : vector<8x128xf32>
    %20 = arith.truncf %19 : vector<8x128xf32> to vector<8x128xbf16>
    %c0_16 = arith.constant 0 : index
    %c0_17 = arith.constant 0 : index
    %21 = vector.load %arg8[%c0_16, %c0_17] : memref<128x128xbf16, #tpu.memory_space<vmem>>, vector<128x128xbf16>
    %cst_18 = arith.constant dense<0.000000e+00> : vector<8x128xf32>
    %22 = tpu.matmul %20, %21, %cst_18 {dimension_numbers = #tpu.dot_dimension_numbers<[1], [0], [0], [1], [0, 0, 1, 1], [], []>} : vector<8x128xbf16>, vector<128x128xbf16>, vector<8x128xf32> -> vector<8x128xf32>
    %c0_19 = arith.constant 0 : index
    %c0_20 = arith.constant 0 : index
    %23 = vector.load %arg9[%c0_19, %c0_20] : memref<1x128xf32, #tpu.memory_space<vmem>>, vector<1x128xf32>
    %24 = vector.broadcast %23 : vector<1x128xf32> to vector<8x128xf32>
    %25 = arith.addf %22, %24 : vector<8x128xf32>
    %c0_21 = arith.constant 0 : index
    %c0_22 = arith.constant 0 : index
    %26 = vector.load %arg10[%c0_21, %c0_22] : memref<8x128xf32, #tpu.memory_space<vmem>>, vector<8x128xf32>
    tpu.vector_store %arg10[%c0_21, %c0_22], %25 {strides = array<i32>} : memref<8x128xf32, #tpu.memory_space<vmem>>, vector<8x128xf32>,
    return
  }
  func.func @transform_0(%arg0: i32) -> (i32, i32) {
    %c0_i32 = arith.constant 0 : i32
    %c0_i32_0 = arith.constant 0 : i32
    return %arg0, %c0_i32 : i32, i32
  }
  func.func @transform_1(%arg0: i32) -> (i32, i32) {
    %c0_i32 = arith.constant 0 : i32
    %c0_i32_0 = arith.constant 0 : i32
    %c0_i32_1 = arith.constant 0 : i32
    return %c0_i32, %c0_i32_0 : i32, i32
  }
  func.func @transform_2(%arg0: i32) -> (i32, i32) {
    %c0_i32 = arith.constant 0 : i32
    %c0_i32_0 = arith.constant 0 : i32
    %c0_i32_1 = arith.constant 0 : i32
    return %c0_i32, %c0_i32_0 : i32, i32
  }
  func.func @transform_3(%arg0: i32) -> (i32, i32) {
    %c0_i32 = arith.constant 0 : i32
    %c0_i32_0 = arith.constant 0 : i32
    return %arg0, %c0_i32 : i32, i32
  }
  func.func @transform_4(%arg0: i32) -> (i32, i32) {
    %c0_i32 = arith.constant 0 : i32
    %c0_i32_0 = arith.constant 0 : i32
    %c0_i32_1 = arith.constant 0 : i32
    return %c0_i32, %c0_i32_0 : i32, i32
  }
  func.func @transform_5(%arg0: i32) -> (i32, i32) {
    %c0_i32 = arith.constant 0 : i32
    %c0_i32_0 = arith.constant 0 : i32
    %c0_i32_1 = arith.constant 0 : i32
    return %c0_i32, %c0_i32_0 : i32, i32
  }
  func.func @transform_6(%arg0: i32) -> (i32, i32) {
    %c0_i32 = arith.constant 0 : i32
    %c0_i32_0 = arith.constant 0 : i32
    return %arg0, %c0_i32 : i32, i32
  }
  func.func @transform_7(%arg0: i32) -> (i32, i32) {
    %c0_i32 = arith.constant 0 : i32
    %c0_i32_0 = arith.constant 0 : i32
    %c0_i32_1 = arith.constant 0 : i32
    return %c0_i32, %c0_i32_0 : i32, i32
  }
  func.func @transform_8(%arg0: i32) -> (i32, i32) {
    %c0_i32 = arith.constant 0 : i32
    %c0_i32_0 = arith.constant 0 : i32
    %c0_i32_1 = arith.constant 0 : i32
    return %c0_i32, %c0_i32_0 : i32, i32
  }
  func.func @transform_9(%arg0: i32) -> (i32, i32) {
    %c0_i32 = arith.constant 0 : i32
    %c0_i32_0 = arith.constant 0 : i32
    return %arg0, %c0_i32 : i32, i32
  }
}

</mosaic_0001>

<bundles_post_ra>
// kernel: tpu_custom_call.1
= control target key start
LH: loop header
LB: loop body
LE: loop exit
PB: predicated region body
PF: predicated region fallthrough
CT: control target
= control target key end

     0   :  { %14 = vsyncpa [#allocation3], 0  ;;  %s1659_s0 = inlined_call_operand.hbm [shape: bf16[8,1024], index: 0, kind: input, shape index: {}]   ;;  %s1660_s1 = inlined_call_operand.hbm [shape: bf16[1024,128], index: 1, kind: input, shape index: {}]   ;;  %s1661_s2 = inlined_call_operand.vmem [shape: f32[1,128], index: 2, kind: input, shape index: {}]   ;;  %s1662_s3 = inlined_call_operand.vmem [shape: f32[8,128], index: 3, kind: input, shape index: {}]   ;;  %s1663_s4 = inlined_call_operand.hbm [shape: bf16[128,128], index: 4, kind: input, shape index: {}]   ;;  %s1664_s5 = inlined_call_operand.vmem [shape: f32[1,128], index: 5, kind: input, shape index: {}]   ;;  %s1665_s6 = inlined_call_operand.vmem [shape: f32[8,128], index: 6, kind: input, shape index: {}]   ;;  %s1666_s7 = inlined_call_operand.hbm [shape: bf16[128,128], index: 7, kind: input, shape index: {}]   ;;  %s1667_s8 = inlined_call_operand.vmem [shape: f32[1,128], index: 8, kind: input, shape index: {}]   ;;  %s1668_s9 = inlined_call_operand.hbm [shape: f32[8,128], index: 9, kind: output, shape index: {}]  }
   0x1   :  { %15 = vsyncpa [#allocation6], 0 }
   0x2   :  { %16 = vsyncpa [#allocation9], 0 }
   0x3   :  { %17 = vsyncpa [#allocation4], 0  ;;  %s1498_s30 = smov [#allocation5]   ;;  %s1380_s13 = scalar_lea.hbm %s1660_s1, 8192 }
   0x4   :  { %s33_s10 = sshll.u32 %s1498_s30, 4  ;;  %p1381_p0 = scmp.ne.s32.totalorder %s1660_s1, %s1380_s13  ;;  %s34_s10 = int_to_ptr.vmem [resolvable:$true] %s33_s10 }
   0x5   :  { %p1384_p1 = scmp.lt.u32.totalorder %s1380_s13, %s1660_s1 }
   0x7   :  { %p1386_p2 = pnand %p1384_p1, %p1381_p0 }
   0x9   :  { %1389 = shalt.err (!%p1386_p2)
}
   0xa   :  { %s1390_s18 = scalar_lea.vmem %s34_s10, 8192  ;;  %p1395_p4 = scmp.lt.s32.totalorder %s34_s10, %s34_s10 }
   0xb   :  { %p1391_p3 = scmp.ne.s32.totalorder %s34_s10, %s1390_s18  ;;  %p1396_p5 = scmp.lt.s32.totalorder %s1390_s18, %s1390_s18 }
   0xd   :  { %p1397_p6 = por %p1396_p5, %p1395_p4 }
   0xf   :  { %p1398_p7 = pnand %p1397_p6, %p1391_p3 }
  0x11   :  { %1401 = shalt.err (!%p1398_p7)
}
  0x12   :  { %s1499_s19 = smov 64   ;;  %s1500_s20 = smov 4  }
  0x13   :  { %39 = dma.hbm_to_vmem [thread:$0]  %s1660_s1, 8192, %s34_s10, [#allocation6], %s1499_s19, %s1499_s19, %s1500_s20  }
  0x14   :  { %s1501_s23 = smov [#allocation2]   ;;  %s1502_s25 = smov [#allocation7]  }
  0x15   :  { %s24_s24 = sshll.u32 %s1501_s23, 4  ;;  %s49_s26 = sshll.u32 %s1502_s25, 4  ;;  %s25_s24 = int_to_ptr.vmem [resolvable:$true] %s24_s24  ;;  %s50_s26 = int_to_ptr.vmem [resolvable:$true] %s49_s26 }
  0x16   :  { %s1402_s29 = scalar_lea.hbm %s1659_s0, 512 }
  0x17   :  { %p1403_p8 = scmp.ne.s32.totalorder %s1659_s0, %s1402_s29  ;;  %p1406_p9 = scmp.lt.u32.totalorder %s1402_s29, %s1659_s0 }
  0x19   :  { %p1408_p10 = pnand %p1406_p9, %p1403_p8 }
  0x1b   :  { %1411 = shalt.err (!%p1408_p10)
}
  0x1c   :  { %s1412_s1 = scalar_lea.vmem %s25_s24, 512  ;;  %p1417_p12 = scmp.lt.s32.totalorder %s25_s24, %s25_s24 }
  0x1d   :  { %p1413_p11 = scmp.ne.s32.totalorder %s25_s24, %s1412_s1  ;;  %p1418_p13 = scmp.lt.s32.totalorder %s1412_s1, %s1412_s1 }
  0x1f   :  { %p1419_p0 = por %p1418_p13, %p1417_p12 }
  0x21   :  { %p1420_p1 = pnand %p1419_p0, %p1413_p11 }
  0x23   :  { %1423 = shalt.err (!%p1420_p1)
}
  0x24   :  { %27 = dma.hbm_to_vmem [thread:$0]  %s1659_s0, 512, %s25_s24, [#allocation3]  }
  0x25   :  { %s1424_s17 = scalar_lea.hbm %s1663_s4, 1024 }
  0x26   :  { %p1425_p2 = scmp.ne.s32.totalorder %s1663_s4, %s1424_s17  ;;  %p1428_p3 = scmp.lt.u32.totalorder %s1424_s17, %s1663_s4 }
  0x28   :  { %p1430_p4 = pnand %p1428_p3, %p1425_p2 }
  0x2a   :  { %1433 = shalt.err (!%p1430_p4)
}
  0x2b   :  { %s1434_s25 = scalar_lea.vmem %s50_s26, 1024  ;;  %p1439_p6 = scmp.lt.s32.totalorder %s50_s26, %s50_s26 }
  0x2c   :  { %p1435_p5 = scmp.ne.s32.totalorder %s50_s26, %s1434_s25  ;;  %p1440_p7 = scmp.lt.s32.totalorder %s1434_s25, %s1434_s25 }
  0x2e   :  { %p1441_p8 = por %p1440_p7, %p1439_p6 }
  0x30   :  { %p1442_p9 = pnand %p1441_p8, %p1435_p5 }
  0x32   :  { %1445 = shalt.err (!%p1442_p9)
}
  0x33   :  { %55 = dma.hbm_to_vmem [thread:$0]  %s1663_s4, 1024, %s50_s26, [#allocation6], %s1499_s19, %s1499_s19, %s1500_s20  }
  0x34   :  { %s1503_s27 = smov [#allocation8]   ;;  %s1446_s11 = scalar_lea.hbm %s1666_s7, 1024 }
  0x35   :  { %s65_s28 = sshll.u32 %s1503_s27, 4  ;;  %p1447_p10 = scmp.ne.s32.totalorder %s1666_s7, %s1446_s11  ;;  %s66_s28 = int_to_ptr.vmem [resolvable:$true] %s65_s28 }
  0x36   :  { %p1450_p11 = scmp.lt.u32.totalorder %s1446_s11, %s1666_s7 }
  0x38   :  { %p1452_p12 = pnand %p1450_p11, %p1447_p10 }
  0x3a   :  { %1455 = shalt.err (!%p1452_p12)
}
  0x3b   :  { %s1456_s14 = scalar_lea.vmem %s66_s28, 1024  ;;  %p1461_p0 = scmp.lt.s32.totalorder %s66_s28, %s66_s28 }
  0x3c   :  { %p1457_p13 = scmp.ne.s32.totalorder %s66_s28, %s1456_s14  ;;  %p1462_p1 = scmp.lt.s32.totalorder %s1456_s14, %s1456_s14 }
  0x3e   :  { %p1463_p2 = por %p1462_p1, %p1461_p0 }
  0x40   :  { %p1464_p3 = pnand %p1463_p2, %p1457_p13 }
  0x42   :  { %1467 = shalt.err (!%p1464_p3)
}
  0x43   :  { %71 = dma.hbm_to_vmem [thread:$0]  %s1666_s7, 1024, %s66_s28, [#allocation9], %s1499_s19, %s1499_s19, %s1500_s20  }
  0x44   :  { %1490 = dma.done.wait [#allocation3], 512  }
  0x45   :  { %1491 = vsyncadd [#allocation3], 4294966784 }
  0x46   :  { %1492 = dma.done.wait [#allocation6], 9216  }
  0x47   :  { %1493 = vsyncadd [#allocation6], 4294958080 }
  0x48   :  { %1494 = dma.done.wait [#allocation9], 1024  }
  0x49   :  { %1495 = vsyncadd [#allocation9], 4294966272  ;;  %v1292_v0 = vld [vmem:[#allocation5 + $0x40] sm:$0xff]   ;;  %v1296_v4 = vld [vmem:[#allocation5 + $0x48] sm:$0xff]   ;;  %vm1505_vm0 = vmmov 0   ;;  %s1506_s22 = smov [#allocation10]  }
  0x4a   :  { %v1293_v1 = vld [vmem:[#allocation5 + $0xc0] sm:$0xff]   ;;  %1137 = vmatprep.subr.bf16.mxu0 %v1292_v0  ;;  %v1297_v5 = vld [vmem:[#allocation5 + $0xc8] sm:$0xff]   ;;  %v1300_v8 = vld [vmem:[#allocation5 + $0x50] sm:$0xff]   ;;  %s1035_s23 = sshll.u32 %s1506_s22, 4  ;;  %s1036_s23 = int_to_ptr.vmem [resolvable:$true] %s1035_s23 }
  0x4b   :  { %v1294_v2 = vld [vmem:[#allocation5] sm:$0xff]   ;;  %1159 = vmatprep.subr.bf16.mxu1 %v1293_v1  ;;  %v1298_v6 = vld [vmem:[#allocation5 + $0x8] sm:$0xff]   ;;  %v1301_v9 = vld [vmem:[#allocation5 + $0xd0] sm:$0xff]   ;;  %p1473_p5 = scmp.lt.s32.totalorder %s1036_s23, %s1036_s23 }
  0x4c   :  { %v1295_v3 = vld [vmem:[#allocation5 + $0x80] sm:$0xff]   ;;  %1138 = vmatpush3.bf16.msra.mxu0 %v1294_v2  ;;  %v1299_v7 = vld [vmem:[#allocation5 + $0x88] sm:$0xff]   ;;  %v1302_v10 = vld [vmem:[#allocation5 + $0x10] sm:$0xff]  }
  0x4d   :  { %1160 = vmatpush3.bf16.msra.mxu1 %v1295_v3  ;;  %1139 = vmatprep.subr.bf16.mxu0 %v1296_v4  ;;  %v1303_v11 = vld [vmem:[#allocation5 + $0x90] sm:$0xff]   ;;  %v1304_v12 = vld [vmem:[#allocation5 + $0x58] sm:$0xff]   ;;  %v1308_v16 = vld [vmem:[#allocation5 + $0x60] sm:$0xff]  }
  0x4e   :  { %1161 = vmatprep.subr.bf16.mxu1 %v1297_v5  ;;  %v1305_v13 = vld [vmem:[#allocation5 + $0xd8] sm:$0xff]   ;;  %v1309_v17 = vld [vmem:[#allocation5 + $0xe0] sm:$0xff]   ;;  %v1312_v20 = vld [vmem:[#allocation5 + $0x68] sm:$0xff]  }
  0x4f   :  { %v1306_v14 = vld [vmem:[#allocation5 + $0x18] sm:$0xff]   ;;  %v1310_v18 = vld [vmem:[#allocation5 + $0x20] sm:$0xff]   ;;  %v1313_v21 = vld [vmem:[#allocation5 + $0xe8] sm:$0xff]  }
  0x50   :  { %1140 = vmatpush3.bf16.msra.mxu0 %v1298_v6  ;;  %v1307_v15 = vld [vmem:[#allocation5 + $0x98] sm:$0xff]   ;;  %v1311_v19 = vld [vmem:[#allocation5 + $0xa0] sm:$0xff]   ;;  %v1314_v22 = vld [vmem:[#allocation5 + $0x28] sm:$0xff]  }
  0x51   :  { %1162 = vmatpush3.bf16.msra.mxu1 %v1299_v7  ;;  %1141 = vmatprep.subr.bf16.mxu0 %v1300_v8  ;;  %v1315_v23 = vld [vmem:[#allocation5 + $0xa8] sm:$0xff]   ;;  %v1316_v24 = vld [vmem:[#allocation5 + $0x70] sm:$0xff]   ;;  %v1320_v28 = vld [vmem:[#allocation5 + $0x78] sm:$0xff]  }
  0x52   :  { %1163 = vmatprep.subr.bf16.mxu1 %v1301_v9  ;;  %v1317_v25 = vld [vmem:[#allocation5 + $0xf0] sm:$0xff]   ;;  %v1321_v29 = vld [vmem:[#allocation5 + $0xf8] sm:$0xff]   ;;  %v87_v32 = vld [vmem:[#allocation2] sm:$0xff] }
  0x53   :  { %v1318_v26 = vld [vmem:[#allocation5 + $0x30] sm:$0xff]   ;;  %v1322_v30 = vld [vmem:[#allocation5 + $0x38] sm:$0xff]   ;;  %v88_v33 = vld [vmem:[#allocation2 + $0x8] sm:$0xff]  ;;  %v1047_v34 = vcombine.low %v87_v32, %v87_v32  ;;  %v1048_v35 = vcombine.high %v87_v32, %v87_v32 }
  0x54   :  { %1142 = vmatpush3.bf16.msra.mxu0 %v1302_v10  ;;  %v1319_v27 = vld [vmem:[#allocation5 + $0xb0] sm:$0xff]   ;;  %v1323_v31 = vld [vmem:[#allocation5 + $0xb8] sm:$0xff]   ;;  %v1049_v36 = vcombine.low %v88_v33, %v88_v33  ;;  %v1050_v37 = vcombine.high %v88_v33, %v88_v33  ;;  %v1328_v38 = vld [vmem:[#allocation5 + $0x140] sm:$0xff]  }
  0x55   :  { %1164 = vmatpush3.bf16.msra.mxu1 %v1303_v11  ;;  %1143 = vmatprep.subr.bf16.mxu0 %v1304_v12  ;;  %v1329_v39 = vld [vmem:[#allocation5 + $0x1c0] sm:$0xff]   ;;  %v1332_v42 = vld [vmem:[#allocation5 + $0x148] sm:$0xff]   ;;  %v1336_v46 = vld [vmem:[#allocation5 + $0x150] sm:$0xff]  }
  0x56   :  { %1165 = vmatprep.subr.bf16.mxu1 %v1305_v13  ;;  %670 = vmatprep.mubr.bf16.mxu0 %v1048_v35  ;;  %v1330_v40 = vld [vmem:[#allocation5 + $0x100] sm:$0xff]   ;;  %v1333_v43 = vld [vmem:[#allocation5 + $0x1c8] sm:$0xff]   ;;  %v1337_v47 = vld [vmem:[#allocation5 + $0x1d0] sm:$0xff]   ;;  %v1504_v13 = vmov 0.0  }
  0x57   :  { %710 = vmatprep.mubr.bf16.mxu1 %v1050_v37  ;;  %v1331_v41 = vld [vmem:[#allocation5 + $0x180] sm:$0xff]   ;;  %v1334_v44 = vld [vmem:[#allocation5 + $0x108] sm:$0xff]   ;;  %v1338_v48 = vld [vmem:[#allocation5 + $0x110] sm:$0xff]  }
  0x58   :  { %1144 = vmatpush3.bf16.msra.mxu0 %v1306_v14  ;;  %v1335_v45 = vld [vmem:[#allocation5 + $0x188] sm:$0xff]   ;;  %v1339_v49 = vld [vmem:[#allocation5 + $0x190] sm:$0xff]   ;;  %v1340_v50 = vld [vmem:[#allocation5 + $0x158] sm:$0xff]  }
  0x59   :  { %1166 = vmatpush3.bf16.msra.mxu1 %v1307_v15  ;;  %1145 = vmatprep.subr.bf16.mxu0 %v1308_v16  ;;  %v1341_v51 = vld [vmem:[#allocation5 + $0x1d8] sm:$0xff]   ;;  %v1344_v54 = vld [vmem:[#allocation5 + $0x160] sm:$0xff]   ;;  %v1348_v58 = vld [vmem:[#allocation5 + $0x168] sm:$0xff]  }
  0x5a   :  { %1167 = vmatprep.subr.bf16.mxu1 %v1309_v17  ;;  %v1342_v52 = vld [vmem:[#allocation5 + $0x118] sm:$0xff]   ;;  %v1345_v55 = vld [vmem:[#allocation5 + $0x1e0] sm:$0xff]   ;;  %v1349_v59 = vld [vmem:[#allocation5 + $0x1e8] sm:$0xff]  }
  0x5b   :  { %v1343_v53 = vld [vmem:[#allocation5 + $0x198] sm:$0xff]   ;;  %v1346_v56 = vld [vmem:[#allocation5 + $0x120] sm:$0xff]   ;;  %v1350_v60 = vld [vmem:[#allocation5 + $0x128] sm:$0xff]  }
  0x5c   :  { %1146 = vmatpush3.bf16.msra.mxu0 %v1310_v18  ;;  %v1347_v57 = vld [vmem:[#allocation5 + $0x1a0] sm:$0xff]   ;;  %v1351_v61 = vld [vmem:[#allocation5 + $0x1a8] sm:$0xff]   ;;  %v1352_v62 = vld [vmem:[#allocation5 + $0x170] sm:$0xff]  }
  0x5d   :  { %1168 = vmatpush3.bf16.msra.mxu1 %v1311_v19  ;;  %1147 = vmatprep.subr.bf16.mxu0 %v1312_v20  ;;  %v1353_v63 = vld [vmem:[#allocation5 + $0x1f0] sm:$0xff]   ;;  %v1356_v2 = vld [vmem:[#allocation5 + $0x178] sm:$0xff]   ;;  %v1364_v12 = vld [vmem:[#allocation7] sm:$0xff]  }
  0x5e   :  { %1169 = vmatprep.subr.bf16.mxu1 %v1313_v21  ;;  %v1354_v0 = vld [vmem:[#allocation5 + $0x130] sm:$0xff]   ;;  %v1357_v3 = vld [vmem:[#allocation5 + $0x1f8] sm:$0xff]   ;;  %v1365_v14 = vld [vmem:[#allocation7 + $0x8] sm:$0xff]  }
  0x5f   :  { %v1355_v1 = vld [vmem:[#allocation5 + $0x1b0] sm:$0xff]   ;;  %v1358_v4 = vld [vmem:[#allocation5 + $0x138] sm:$0xff]   ;;  %v1368_v17 = vld [vmem:[#allocation7 + $0x20] sm:$0xff]  }
  0x60   :  { %1148 = vmatpush3.bf16.msra.mxu0 %v1314_v22  ;;  %v1359_v5 = vld [vmem:[#allocation5 + $0x1b8] sm:$0xff]   ;;  %v89_v6 = vld [vmem:[#allocation2 + $0x10] sm:$0xff]  ;;  %v1369_v18 = vld [vmem:[#allocation7 + $0x28] sm:$0xff]  }
  0x61   :  { %1170 = vmatpush3.bf16.msra.mxu1 %v1315_v23  ;;  %1149 = vmatprep.subr.bf16.mxu0 %v1316_v24  ;;  %v1051_v7 = vcombine.low %v89_v6, %v89_v6  ;;  %v1052_v8 = vcombine.high %v89_v6, %v89_v6  ;;  %v90_v9 = vld [vmem:[#allocation2 + $0x18] sm:$0xff]  ;;  %v1366_v15 = vld [vmem:[#allocation7 + $0x10] sm:$0xff]   ;;  %v1372_v21 = vld [vmem:[#allocation8] sm:$0xff]  }
  0x62   :  { %1171 = vmatprep.subr.bf16.mxu1 %v1317_v25  ;;  %v1053_v10 = vcombine.low %v90_v9, %v90_v9  ;;  %v1054_v11 = vcombine.high %v90_v9, %v90_v9  ;;  %v1367_v16 = vld [vmem:[#allocation7 + $0x18] sm:$0xff]   ;;  %v1370_v19 = vld [vmem:[#allocation7 + $0x30] sm:$0xff]   ;;  %v1373_v22 = vld [vmem:[#allocation8 + $0x8] sm:$0xff]  }
  0x63   :  { %v1371_v20 = vld [vmem:[#allocation7 + $0x38] sm:$0xff]   ;;  %v1374_v23 = vld [vmem:[#allocation8 + $0x10] sm:$0xff]   ;;  %v1376_v25 = vld [vmem:[#allocation8 + $0x20] sm:$0xff]  }
  0x64   :  { %1150 = vmatpush3.bf16.msra.mxu0 %v1318_v26  ;;  %v1375_v24 = vld [vmem:[#allocation8 + $0x18] sm:$0xff]   ;;  %v1377_v26 = vld [vmem:[#allocation8 + $0x28] sm:$0xff]  }
  0x65   :  { %1172 = vmatpush3.bf16.msra.mxu1 %v1319_v27  ;;  %1151 = vmatprep.subr.bf16.mxu0 %v1320_v28 }
  0x66   :  { %1173 = vmatprep.subr.bf16.mxu1 %v1321_v29  ;;  %v1046_v29 = vld [vmem:[%s1661_s2] ss:$0 sm:$0xff] }
  0x68   :  { %1152 = vmatpush3.bf16.msra.mxu0 %v1322_v30 }
  0x69   :  { %1174 = vmatpush3.bf16.msra.mxu1 %v1323_v31  ;;  %1181 = vmatprep.subr.bf16.mxu0 %v1328_v38 }
  0x6a   :  { %1203 = vmatprep.subr.bf16.mxu1 %v1329_v39 }
  0x6b   :  { %671 = vmatmul.mubr.bf16.vlgmr.msra.gmra.mrb[0].mxu0 %v1047_v34 }
  0x6c   :  { %711 = vmatmul.mubr.bf16.vlgmr.msra.gmra.mrb[0].mxu1 %v1049_v36  ;;  %1182 = vmatpush3.bf16.msra.mxu0 %v1330_v40 }
  0x6d   :  { %1204 = vmatpush3.bf16.msra.mxu1 %v1331_v41  ;;  %1183 = vmatprep.subr.bf16.mxu0 %v1332_v42 }
  0x6e   :  { %1205 = vmatprep.subr.bf16.mxu1 %v1333_v43  ;;  %750 = vmatprep.mubr.bf16.mxu0 %v1052_v8 }
  0x6f   :  { %790 = vmatprep.mubr.bf16.mxu1 %v1054_v11 }
  0x70   :  { %1184 = vmatpush3.bf16.msra.mxu0 %v1334_v44 }
  0x71   :  { %1206 = vmatpush3.bf16.msra.mxu1 %v1335_v45  ;;  %1185 = vmatprep.subr.bf16.mxu0 %v1336_v46 }
  0x72   :  { %1207 = vmatprep.subr.bf16.mxu1 %v1337_v47 }
  0x74   :  { %1186 = vmatpush3.bf16.msra.mxu0 %v1338_v48 }
  0x75   :  { %1208 = vmatpush3.bf16.msra.mxu1 %v1339_v49  ;;  %1187 = vmatprep.subr.bf16.mxu0 %v1340_v50 }
  0x76   :  { %1209 = vmatprep.subr.bf16.mxu1 %v1341_v51 }
  0x78   :  { %1188 = vmatpush3.bf16.msra.mxu0 %v1342_v52  ;;  %v799_v52 = vld [vmem:[%s1662_s3] sm:$0xff] }
  0x79   :  { %1210 = vmatpush3.bf16.msra.mxu1 %v1343_v53  ;;  %1189 = vmatprep.subr.bf16.mxu0 %v1344_v54 }
  0x7a   :  { %1211 = vmatprep.subr.bf16.mxu1 %v1345_v55 }
  0x7c   :  { %1190 = vmatpush3.bf16.msra.mxu0 %v1346_v56  ;;  %v1378_v56 = vld [vmem:[#allocation8 + $0x30] sm:$0xff]  }
  0x7d   :  { %1212 = vmatpush3.bf16.msra.mxu1 %v1347_v57  ;;  %1191 = vmatprep.subr.bf16.mxu0 %v1348_v58  ;;  %v1379_v57 = vld [vmem:[#allocation8 + $0x38] sm:$0xff]   ;;  %v1119_v58 = vld [vmem:[%s1664_s5] ss:$0 sm:$0xff]  ;;  %s1468_s5 = scalar_lea.vmem %s1036_s23, 128 }
  0x7e   :  { %1213 = vmatprep.subr.bf16.mxu1 %v1349_v59  ;;  %p1469_p4 = scmp.ne.s32.totalorder %s1036_s23, %s1468_s5  ;;  %p1474_p6 = scmp.lt.s32.totalorder %s1468_s5, %s1468_s5 }
  0x80   :  { %1192 = vmatpush3.bf16.msra.mxu0 %v1350_v60  ;;  %p1475_p7 = por %p1474_p6, %p1473_p5 }
  0x81   :  { %1214 = vmatpush3.bf16.msra.mxu1 %v1351_v61  ;;  %1193 = vmatprep.subr.bf16.mxu0 %v1352_v62  ;;  %v914_v62 = vld [vmem:[%s1665_s6] sm:$0xff] }
  0x82   :  { %1215 = vmatprep.subr.bf16.mxu1 %v1353_v63  ;;  %p1476_p8 = pnand %p1475_p7, %p1469_p4 }
  0x84   :  { %1194 = vmatpush3.bf16.msra.mxu0 %v1354_v0 }
  0x85   :  { %1216 = vmatpush3.bf16.msra.mxu1 %v1355_v1  ;;  %1195 = vmatprep.subr.bf16.mxu0 %v1356_v2 }
  0x86   :  { %1217 = vmatprep.subr.bf16.mxu1 %v1357_v3 }
  0x88   :  { %1196 = vmatpush3.bf16.msra.mxu0 %v1358_v4  ;;  %v1128_v4 = vld [vmem:[%s1667_s8] ss:$0 sm:$0xff] }
  0x89   :  { %1218 = vmatpush3.bf16.msra.mxu1 %v1359_v5  ;;  %1243 = vmatprep.subr.bf16.mxu0 %v1504_v13 }
  0x8a   :  { %1263 = vmatprep.subr.bf16.mxu1 %v1504_v13 }
  0x8b   :  { %751 = vmatmul.mubr.bf16.vlgmr.msra.gmra.mrb[4].mxu0 %v1051_v7 }
  0x8c   :  { %791 = vmatmul.mubr.bf16.vlgmr.msra.gmra.mrb[4].mxu1 %v1053_v10  ;;  %1244 = vmatpush3.bf16.msra.mxu0 %v1364_v12 }
  0x8d   :  { %1245 = vmatprep.subr.bf16.mxu0 %v1504_v13  ;;  %1259 = vmatprep.mubr.msk.bf16.mxu0 %vm1505_vm0, %v1504_v13 }
  0x8e   :  { %1279 = vmatprep.mubr.msk.bf16.mxu1 %vm1505_vm0, %v1504_v13  ;;  %1264 = vmatpush3.bf16.msra.mxu1 %v1372_v21 }
  0x8f   :  { %1265 = vmatprep.subr.bf16.mxu1 %v1504_v13 }
  0x90   :  { %1246 = vmatpush3.bf16.msra.mxu0 %v1365_v14 }
  0x91   :  { %1247 = vmatprep.subr.bf16.mxu0 %v1504_v13 }
  0x92   :  { %1266 = vmatpush3.bf16.msra.mxu1 %v1373_v22 }
  0x93   :  { %1267 = vmatprep.subr.bf16.mxu1 %v1504_v13 }
  0x94   :  { %1248 = vmatpush3.bf16.msra.mxu0 %v1366_v15 }
  0x95   :  { %1249 = vmatprep.subr.bf16.mxu0 %v1504_v13 }
  0x96   :  { %1268 = vmatpush3.bf16.msra.mxu1 %v1374_v23 }
  0x97   :  { %1269 = vmatprep.subr.bf16.mxu1 %v1504_v13 }
  0x98   :  { %1250 = vmatpush3.bf16.msra.mxu0 %v1367_v16 }
  0x99   :  { %1251 = vmatprep.subr.bf16.mxu0 %v1504_v13 }
  0x9a   :  { %1270 = vmatpush3.bf16.msra.mxu1 %v1375_v24 }
  0x9b   :  { %1271 = vmatprep.subr.bf16.mxu1 %v1504_v13 }
  0x9c   :  { %1252 = vmatpush3.bf16.msra.mxu0 %v1368_v17 }
  0x9d   :  { %1253 = vmatprep.subr.bf16.mxu0 %v1504_v13 }
  0x9e   :  { %1272 = vmatpush3.bf16.msra.mxu1 %v1376_v25 }
  0x9f   :  { %1273 = vmatprep.subr.bf16.mxu1 %v1504_v13 }
  0xa0   :  { %1254 = vmatpush3.bf16.msra.mxu0 %v1369_v18 }
  0xa1   :  { %1255 = vmatprep.subr.bf16.mxu0 %v1504_v13 }
  0xa2   :  { %1274 = vmatpush3.bf16.msra.mxu1 %v1377_v26 }
  0xa3   :  { %1275 = vmatprep.subr.bf16.mxu1 %v1504_v13 }
  0xa4   :  { %1256 = vmatpush3.bf16.msra.mxu0 %v1370_v19 }
  0xa5   :  { %1257 = vmatprep.subr.bf16.mxu0 %v1504_v13 }
  0xa6   :  { %1276 = vmatpush3.bf16.msra.mxu1 %v1378_v56 }
  0xa7   :  { %1277 = vmatprep.subr.bf16.mxu1 %v1504_v13 }
  0xa8   :  { %1258 = vmatpush3.bf16.msra.mxu0 %v1371_v20 }
  0xaa   :  { %1278 = vmatpush3.bf16.msra.mxu1 %v1379_v57 }
 0x13e   :  { %v1153_v27 = vpop.f32.mrb[0].mxu0 }
 0x13f   :  { %v1175_v28 = vpop.f32.mrb[0].mxu1  ;;  %v1154_v30 = vpop.f32.mrb[1].mxu0 }
 0x140   :  { %v1176_v31 = vpop.f32.mrb[1].mxu1  ;;  %v1155_v32 = vadd.f32 %v1154_v30, %v1153_v27  ;;  %v1156_v34 = vpop.f32.mrb[2].mxu0 }
 0x141   :  { %v1177_v33 = vadd.f32 %v1176_v31, %v1175_v28  ;;  %v1178_v35 = vpop.f32.mrb[2].mxu1  ;;  %v1157_v36 = vpop.f32.mrb[3].mxu0 }
 0x142   :  { %v1179_v37 = vpop.f32.mrb[3].mxu1  ;;  %v673_v38 = vadd.f32 %v1155_v32, %v1046_v29 }
 0x144   :  { %v713_v39 = vadd.f32 %v1177_v33, %v673_v38 }
 0x15e   :  { %v1197_v40 = vpop.f32.mrb[4].mxu0 }
 0x15f   :  { %v1219_v41 = vpop.f32.mrb[4].mxu1  ;;  %v1198_v42 = vpop.f32.mrb[5].mxu0 }
 0x160   :  { %v1220_v43 = vpop.f32.mrb[5].mxu1  ;;  %v1199_v44 = vadd.f32 %v1198_v42, %v1197_v40  ;;  %v1200_v46 = vpop.f32.mrb[6].mxu0 }
 0x161   :  { %v1221_v45 = vadd.f32 %v1220_v43, %v1219_v41  ;;  %v1222_v47 = vpop.f32.mrb[6].mxu1  ;;  %v1201_v48 = vpop.f32.mrb[7].mxu0 }
 0x162   :  { %v1223_v49 = vpop.f32.mrb[7].mxu1  ;;  %v753_v50 = vadd.f32 %v1199_v44, %v713_v39 }
 0x164   :  { %v793_v51 = vadd.f32 %v1221_v45, %v753_v50 }
 0x166   :  { %v798_v53 = vmax.f32 %v793_v51, 0.0 }
 0x168   :  { %v800_v54 = vmul.f32 %v799_v52, %v798_v53 }
 0x16a   :  { %v801_v55 = vpack.c.bf16 %v800_v54, %v800_v54 }
 0x16c   :  { %1260 = vmatmul.mubr.bf16.vlgmr.msra.gmra.mrb[8].mxu0 %v801_v55 }
 0x23f   :  { %v907_v59 = vpop.f32.mrb[8].mxu0 }
 0x240   :  { %v908_v60 = vadd.f32 %v1119_v58, %v907_v59  ;;  %v1261_v61 = vpop.f32.mrb[9].mxu0 }
 0x241   :  { %v910_v63 = vpop.f32.mrb[10].mxu0 }
 0x242   :  { %v913_v0 = vmax.f32 %v908_v60, 0.0  ;;  %v1262_v1 = vpop.f32.mrb[11].mxu0 }
 0x244   :  { %v915_v2 = vmul.f32 %v914_v62, %v913_v0 }
 0x246   :  { %v916_v3 = vpack.c.bf16 %v915_v2, %v915_v2 }
 0x248   :  { %1280 = vmatmul.mubr.bf16.vlgmr.msra.gmra.mrb[8].mxu1 %v916_v3 }
 0x31b   :  { %v1022_v5 = vpop.f32.mrb[8].mxu1 }
 0x31c   :  { %v1023_v6 = vadd.f32 %v1128_v4, %v1022_v5  ;;  %v1281_v7 = vpop.f32.mrb[9].mxu1 }
 0x31d   :  { %v1025_v8 = vpop.f32.mrb[10].mxu1 }
 0x31e   :  { %1028 = vst [vmem:[#allocation10] sm:$0xff] %v1023_v6  ;;  %v1282_v9 = vpop.f32.mrb[11].mxu1 }
 0x31f   :  { %1479 = shalt.err (!%p1476_p8)
}
 0x320   :  { %s1480_s8 = scalar_lea.hbm %s1668_s9, 128 }
 0x321   :  { %p1481_p9 = scmp.ne.s32.totalorder %s1668_s9, %s1480_s8  ;;  %p1484_p10 = scmp.lt.u32.totalorder %s1480_s8, %s1668_s9 }
 0x323   :  { %p1486_p11 = pnand %p1484_p10, %p1481_p9 }
 0x325   :  { %1489 = shalt.err (!%p1486_p11)
}
 0x326   :  { %1038 = dma.vmem_to_hbm [thread:$0]  %s1036_s23, 128, %s1668_s9, [#allocation4]  }
 0x327   :  { %1496 = dma.done.wait [#allocation4], 128  }
 0x328   :  { %1497 = vsyncadd [#allocation4], 4294967168 }
 0x329   :  { %1042 = vsyncpa [#allocation3], 1 }
 0x32a   :  { %1043 = vsyncpa [#allocation6], 1 }
 0x32b   :  { %1044 = vsyncpa [#allocation9], 1 }
 0x32c   :  { %1045 = vsyncpa [#allocation4], 1 }

</bundles_post_ra>
